<compile_context>
chip_gen: v7x
topology: tpu7x:2x2x1
jax: 0.10.0
libtpu: 0.0.40
codegen_flags: <defaults>
</compile_context>

<pallas_src>
import math

import jax
import jax.numpy as jnp
from jax.experimental import pallas as pl
from jax.experimental.pallas import tpu as pltpu


def _rope_kernel(start_ref, invfreq_ref, x_ref, o_ref):
    """Rotate one (TB, TS, L) block of x.

    start_ref   : SMEM (1,) int32   -- scalar-prefetched start_pos
    invfreq_ref : VMEM (1, L) f32   -- per-lane inverse frequency (head-tiled)
    x_ref/o_ref : VMEM (TB, TS, L)  -- batch tile x seq tile x (heads*dim)
    """
    tb, ts, L = x_ref.shape
    si = pl.program_id(0)

    # ---- cos/sin generated on-chip (EUP slot) -- zero table HBM traffic ----
    row = jax.lax.broadcasted_iota(jnp.int32, (ts, 1), 0)
    pos = (start_ref[0] + si * ts + row).astype(jnp.float32)        # (ts, 1)
    ang = pos * invfreq_ref[...]                                     # (ts, L)
    cos = jnp.cos(ang)
    sin = jnp.sin(ang)

    # Even lanes (2j) take -sin * partner(2j+1); odd lanes (2j+1) take
    # +sin * partner(2j).  The zeroed lanes mask out the roll wrap-around and
    # any cross-head neighbour, which is what makes the full-row roll correct.
    even = (jax.lax.broadcasted_iota(jnp.int32, (ts, L), 1) & 1) == 0
    sin_l = jnp.where(even, -sin, 0.0)     # multiplies the lane+1 partner
    sin_r = jnp.where(even, 0.0, sin)      # multiplies the lane-1 partner

    # Static unroll over the small (<=8) batch tile: cos/sin are computed once
    # per seq block and shared across the batch rows; the per-slice work is
    # pure 2-D VPU math plus two cheap XLU lane rotations.
    for i in range(tb):
        x = x_ref[i].astype(jnp.float32)           # f32 compute == x.float()
        x_next = pltpu.roll(x, L - 1, 1)           # x[(k+1) % L]
        x_prev = pltpu.roll(x, 1, 1)               # x[(k-1) % L]
        o_ref[i] = (x * cos + x_next * sin_l + x_prev * sin_r).astype(o_ref.dtype)


def make_inv_freq_lanes(num_heads, head_dim, theta=10000.0):
    """Per-lane inverse frequency for the flattened (n*d) lane axis.

    This is the only constant the kernel reads ((1, n*d) f32, a few KiB); the
    big per-position cos/sin tables of the torch module are generated on-chip.
    """
    j = jnp.arange(0, head_dim, 2, dtype=jnp.float32)
    inv = jnp.exp(j * (-math.log(theta) / head_dim))            # (d/2,)
    inv_lane = jnp.repeat(inv, 2)                                # (d,)  [f0,f0,f1,f1,...]
    inv_lane = jnp.tile(inv_lane, (num_heads,))                  # (n*d,)
    return inv_lane.reshape(1, num_heads * head_dim)


def rotary_embedding(x, inv_freq_lanes, start_pos=0, *, num_embeddings=None):
    """x: (b, s, n, d) -> rotary-rotated (b, s, n, d), same dtype as x.

    start_pos may be a Python int or a traced int32 scalar.
    """
    b, s, n, d = x.shape
    L = n * d
    assert d % 2 == 0, "head_dim must be even"
    assert inv_freq_lanes.shape == (1, L)
    if num_embeddings is not None and isinstance(start_pos, int):
        assert start_pos + s <= num_embeddings, (
            f"position window [{start_pos}, {start_pos + s}) exceeds "
            f"num_embeddings={num_embeddings}")
    # NOTE: L should be a multiple of 128 for lane-dense (unmasked) stores.

    x3 = x.reshape(b, s, L)                 # pure reshape (d innermost): no copy
    itemsize = x3.dtype.itemsize

    # ---- block sizing: byte-targeted and generation-aware -------------------
    try:
        vmem_cap = int(pltpu.get_tpu_info().vmem_capacity_bytes)
    except Exception:
        vmem_cap = 64 * 1024 * 1024         # v7x per-core VMEM (smallest case)

    tb = min(b, 8)                          # batch rows folded into the block
    row_bytes = tb * L * itemsize           # one seq row of the x block
    target_block_bytes = 2 * 1024 * 1024    # ~2 MiB of x per grid step
    # Rough per-seq-row VMEM: in+out double-buffered + f32 temporaries.
    per_row_vmem = 4 * row_bytes + (6 + 4 * tb) * L * 4
    vmem_budget = vmem_cap // 2

    ts = max(1, min(s, target_block_bytes // max(row_bytes, 1)))
    ts = min(ts, max(1, vmem_budget // max(per_row_vmem, 1)))
    if s >= 16:
        ts = min(ts, pl.cdiv(s, 2))         # >= 2 seq steps so both v7x cores work
    if ts < s:
        ts = min(s, max(8, (ts // 8) * 8))  # sublane-aligned unless covering all of s
    else:
        ts = s
    ns = pl.cdiv(s, ts)
    nb = pl.cdiv(b, tb)

    block_io = tb * ts * L * itemsize
    vmem_need = 4 * block_io + (6 + 4 * tb) * ts * L * 4 + (1 << 20)
    vmem_limit = min(int(vmem_cap * 0.9), max(32 * 1024 * 1024, vmem_need))

    cost = pl.CostEstimate(
        flops=int(10 * b * s * L),
        transcendentals=int(2 * ns * ts * L),   # sin+cos once per seq block
        bytes_accessed=int(2 * x3.size * itemsize + L * 4 + 4),
    )

    start = jnp.asarray(start_pos, dtype=jnp.int32).reshape(1)

    out = pl.pallas_call(
        _rope_kernel,
        out_shape=jax.ShapeDtypeStruct((b, s, L), x.dtype),
        grid_spec=pltpu.PrefetchScalarGridSpec(
            num_scalar_prefetch=1,
            grid=(ns, nb),
            in_specs=[
                # Constant block index -> the tiny inv-freq vector is DMA'd once.
                pl.BlockSpec((1, L), lambda si, bi, sp: (0, 0)),
                pl.BlockSpec((tb, ts, L), lambda si, bi, sp: (bi, si, 0)),
            ],
            out_specs=pl.BlockSpec((tb, ts, L), lambda si, bi, sp: (bi, si, 0)),
        ),
        compiler_params=pltpu.CompilerParams(
            dimension_semantics=("parallel", "parallel"),
            vmem_limit_bytes=int(vmem_limit),
        ),
        cost_estimate=cost,
    )(start, inv_freq_lanes, x3)

    return out.reshape(b, s, n, d)


def _reference(x, num_embeddings, theta, start_pos=0):
    """Plain-JAX port of the torch complex-number forward."""
    b, s, n, d = x.shape
    pos = jnp.arange(num_embeddings, dtype=jnp.float32)
    div_term = jnp.exp(
        jnp.arange(0, d, 2, dtype=jnp.float32) * (-math.log(theta) / d)
    )
    freqs = jnp.outer(pos, div_term)[start_pos:start_pos + s]   # (s, d/2)
    w = jax.lax.complex(jnp.cos(freqs), jnp.sin(freqs))[None, :, None, :]
    xf = x.astype(jnp.float32).reshape(b, s, n, d // 2, 2)
    xc = jax.lax.complex(xf[..., 0], xf[..., 1])
    yc = xc * w
    y = jnp.stack([jnp.real(yc), jnp.imag(yc)], axis=-1).reshape(b, s, n, d)
    return y.astype(x.dtype)


if __name__ == "__main__":
    # (b, s, n, d) — small shapes consistent with the module's forward.
    B, S, N, D = 2, 8, 4, 32          # n*d = 128 -> lane-dense last dim
    NUM_EMB, THETA = 16, 10000.0

    x = jax.random.normal(jax.random.PRNGKey(0), (B, S, N, D), dtype=jnp.float32)
    inv_freq = make_inv_freq_lanes(N, D, THETA)

    out0 = jax.block_until_ready(
        rotary_embedding(x, inv_freq, start_pos=0, num_embeddings=NUM_EMB))
    out3 = jax.block_until_ready(
        rotary_embedding(x, inv_freq, start_pos=3, num_embeddings=NUM_EMB))

    ref0 = _reference(x, NUM_EMB, THETA, start_pos=0)
    ref3 = _reference(x, NUM_EMB, THETA, start_pos=3)

    assert out0.shape == (B, S, N, D)
    assert jnp.allclose(out0, ref0, atol=1e-4, rtol=1e-4), \
        float(jnp.max(jnp.abs(out0 - ref0)))
    assert jnp.allclose(out3, ref3, atol=1e-4, rtol=1e-4), \
        float(jnp.max(jnp.abs(out3 - ref3)))
    print("KERNEL_OK")
</pallas_src>

<mosaic_0001>
module attributes {stable_mosaic.version = 11 : i64} {
  func.func @_rope_kernel(%arg0: i32, %arg1: i32, %arg2: memref<1xi32, #tpu.memory_space<smem>>, %arg3: memref<1x128xf32, #tpu.memory_space<vmem>>, %arg4: memref<2x8x128xf32, #tpu.memory_space<vmem>>, %arg5: memref<2x8x128xf32, #tpu.memory_space<vmem>>) attributes {dimension_semantics = [#tpu.dimension_semantics<parallel>, #tpu.dimension_semantics<parallel>], iteration_bounds = array<i64: 1, 1>, scalar_prefetch = 1 : i64, scratch_operands = 0 : i64, tpu.core_type = #tpu.core_type<tc>, window_params = [{pipeline_mode = #tpu.pipeline_mode<synchronous>, transform_indices = @transform_0, window_bounds = array<i64: 1, 128>}, {transform_indices = @transform_1, window_bounds = array<i64: 2, 8, 128>}, {transform_indices = @transform_2, window_bounds = array<i64: 2, 8, 128>}]} {
    %0 = tpu.iota {dimensions = array<i32: 0>} : vector<8x1xi32>
    %c0 = arith.constant 0 : index
    %1 = memref.load %arg2[%c0] : memref<1xi32, #tpu.memory_space<smem>>
    %c8_i32 = arith.constant 8 : i32
    %2 = arith.muli %arg0, %c8_i32 : i32
    %3 = arith.addi %1, %2 : i32
    %4 = vector.broadcast %3 : i32 to vector<8x1xi32>
    %5 = arith.addi %4, %0 : vector<8x1xi32>
    %6 = arith.sitofp %5 : vector<8x1xi32> to vector<8x1xf32>
    %c0_0 = arith.constant 0 : index
    %c0_1 = arith.constant 0 : index
    %7 = vector.load %arg3[%c0_0, %c0_1] : memref<1x128xf32, #tpu.memory_space<vmem>>, vector<1x128xf32>
    %8 = vector.broadcast %6 : vector<8x1xf32> to vector<8x128xf32>
    %9 = vector.broadcast %7 : vector<1x128xf32> to vector<8x128xf32>
    %10 = arith.mulf %8, %9 : vector<8x128xf32>
    %11 = math.cos %10 : vector<8x128xf32>
    %12 = math.sin %10 : vector<8x128xf32>
    %13 = tpu.iota {dimensions = array<i32: 1>} : vector<8x128xi32>
    %c1_i32 = arith.constant 1 : i32
    %14 = vector.broadcast %c1_i32 : i32 to vector<8x128xi32>
    %15 = arith.andi %13, %14 : vector<8x128xi32>
    %c0_i32 = arith.constant 0 : i32
    %16 = vector.broadcast %c0_i32 : i32 to vector<8x128xi32>
    %17 = arith.cmpi eq, %15, %16 : vector<8x128xi32>
    %cst = arith.constant 0.000000e+00 : f32
    %18 = vector.broadcast %cst : f32 to vector<8x128xf32>
    %19 = arith.subf %18, %12 : vector<8x128xf32>
    %cst_2 = arith.constant 0.000000e+00 : f32
    %20 = vector.broadcast %cst_2 : f32 to vector<8x128xf32>
    %21 = arith.select %17, %19, %20 : vector<8x128xi1>, vector<8x128xf32>
    %cst_3 = arith.constant 0.000000e+00 : f32
    %22 = vector.broadcast %cst_3 : f32 to vector<8x128xf32>
    %23 = arith.select %17, %22, %12 : vector<8x128xi1>, vector<8x128xf32>
    %c0_4 = arith.constant 0 : index
    %c0_5 = arith.constant 0 : index
    %c0_6 = arith.constant 0 : index
    %24 = vector.load %arg4[%c0_4, %c0_5, %c0_6] : memref<2x8x128xf32, #tpu.memory_space<vmem>>, vector<1x8x128xf32>
    %25 = vector.shape_cast %24 : vector<1x8x128xf32> to vector<8x128xf32>
    %c127_i32 = arith.constant 127 : i32
    %26 = tpu.dynamic_rotate %25 by %c127_i32 dim 1 : vector<8x128xf32>, i32 -> vector<8x128xf32>
    %c1_i32_7 = arith.constant 1 : i32
    %27 = tpu.dynamic_rotate %25 by %c1_i32_7 dim 1 : vector<8x128xf32>, i32 -> vector<8x128xf32>
    %28 = arith.mulf %25, %11 : vector<8x128xf32>
    %29 = arith.mulf %26, %21 : vector<8x128xf32>
    %30 = arith.addf %28, %29 : vector<8x128xf32>
    %31 = arith.mulf %27, %23 : vector<8x128xf32>
    %32 = arith.addf %30, %31 : vector<8x128xf32>
    %c0_8 = arith.constant 0 : index
    %c0_9 = arith.constant 0 : index
    %c0_10 = arith.constant 0 : index
    %33 = vector.load %arg5[%c0_8, %c0_9, %c0_10] : memref<2x8x128xf32, #tpu.memory_space<vmem>>, vector<1x8x128xf32>
    %34 = vector.shape_cast %33 : vector<1x8x128xf32> to vector<8x128xf32>
    %35 = vector.shape_cast %32 : vector<8x128xf32> to vector<1x8x128xf32>
    tpu.vector_store %arg5[%c0_8, %c0_9, %c0_10], %35 {strides = array<i32>} : memref<2x8x128xf32, #tpu.memory_space<vmem>>, vector<1x8x128xf32>,
    %c1 = arith.constant 1 : index
    %c0_11 = arith.constant 0 : index
    %c0_12 = arith.constant 0 : index
    %36 = vector.load %arg4[%c1, %c0_11, %c0_12] : memref<2x8x128xf32, #tpu.memory_space<vmem>>, vector<1x8x128xf32>
    %37 = vector.shape_cast %36 : vector<1x8x128xf32> to vector<8x128xf32>
    %c127_i32_13 = arith.constant 127 : i32
    %38 = tpu.dynamic_rotate %37 by %c127_i32_13 dim 1 : vector<8x128xf32>, i32 -> vector<8x128xf32>
    %c1_i32_14 = arith.constant 1 : i32
    %39 = tpu.dynamic_rotate %37 by %c1_i32_14 dim 1 : vector<8x128xf32>, i32 -> vector<8x128xf32>
    %40 = arith.mulf %37, %11 : vector<8x128xf32>
    %41 = arith.mulf %38, %21 : vector<8x128xf32>
    %42 = arith.addf %40, %41 : vector<8x128xf32>
    %43 = arith.mulf %39, %23 : vector<8x128xf32>
    %44 = arith.addf %42, %43 : vector<8x128xf32>
    %c1_15 = arith.constant 1 : index
    %c0_16 = arith.constant 0 : index
    %c0_17 = arith.constant 0 : index
    %45 = vector.load %arg5[%c1_15, %c0_16, %c0_17] : memref<2x8x128xf32, #tpu.memory_space<vmem>>, vector<1x8x128xf32>
    %46 = vector.shape_cast %45 : vector<1x8x128xf32> to vector<8x128xf32>
    %47 = vector.shape_cast %44 : vector<8x128xf32> to vector<1x8x128xf32>
    tpu.vector_store %arg5[%c1_15, %c0_16, %c0_17], %47 {strides = array<i32>} : memref<2x8x128xf32, #tpu.memory_space<vmem>>, vector<1x8x128xf32>,
    return
  }
  func.func @transform_0(%arg0: i32, %arg1: i32, %arg2: memref<1xi32, #tpu.memory_space<smem>>) -> (i32, i32) {
    %c0_i32 = arith.constant 0 : i32
    %c0_i32_0 = arith.constant 0 : i32
    %c0_i32_1 = arith.constant 0 : i32
    return %c0_i32, %c0_i32_0 : i32, i32
  }
  func.func @transform_1(%arg0: i32, %arg1: i32, %arg2: memref<1xi32, #tpu.memory_space<smem>>) -> (i32, i32, i32) {
    %c0_i32 = arith.constant 0 : i32
    %c0_i32_0 = arith.constant 0 : i32
    return %arg1, %arg0, %c0_i32 : i32, i32, i32
  }
  func.func @transform_2(%arg0: i32, %arg1: i32, %arg2: memref<1xi32, #tpu.memory_space<smem>>) -> (i32, i32, i32) {
    %c0_i32 = arith.constant 0 : i32
    %c0_i32_0 = arith.constant 0 : i32
    return %arg1, %arg0, %c0_i32 : i32, i32, i32
  }
}

</mosaic_0001>

<bundles_post_ra>
// kernel: tpu_custom_call.1
= control target key start
LH: loop header
LB: loop body
LE: loop exit
PB: predicated region body
PF: predicated region fallthrough
CT: control target
= control target key end

     0   :  { %9 = vsyncpa [#allocation5], 0  ;;  %s481_s0 = inlined_call_operand.<no memory space> [shape: s32[1], index: 0, kind: input, shape index: {}]   ;;  %s482_s1 = inlined_call_operand.vmem [shape: f32[1,128], index: 1, kind: input, shape index: {}]   ;;  %s483_s2 = inlined_call_operand.hbm [shape: f32[2,8,128], index: 2, kind: input, shape index: {}]   ;;  %s484_s3 = inlined_call_operand.hbm [shape: f32[2,8,128], index: 3, kind: output, shape index: {}]  }
   0x1   :  { %10 = vsyncpa [#allocation6], 0  ;;  %s376_s12 = smov [#allocation4]   ;;  %s328_s16 = scalar_lea.hbm %s483_s2, 256 }
   0x2   :  { %s18_s13 = sshll.u32 %s376_s12, 4  ;;  %p329_p0 = scmp.ne.s32.totalorder %s483_s2, %s328_s16  ;;  %s19_s13 = int_to_ptr.vmem [resolvable:$true] %s18_s13 }
   0x3   :  { %p332_p1 = scmp.lt.u32.totalorder %s328_s16, %s483_s2 }
   0x5   :  { %p334_p2 = pnand %p332_p1, %p329_p0 }
   0x7   :  { %337 = shalt.err (!%p334_p2)
}
   0x8   :  { %s338_s21 = scalar_lea.vmem %s19_s13, 256  ;;  %p343_p4 = scmp.lt.s32.totalorder %s19_s13, %s19_s13 }
   0x9   :  { %p339_p3 = scmp.ne.s32.totalorder %s19_s13, %s338_s21  ;;  %p344_p5 = scmp.lt.s32.totalorder %s338_s21, %s338_s21 }
   0xb   :  { %p345_p6 = por %p344_p5, %p343_p4 }
   0xd   :  { %p346_p7 = pnand %p345_p6, %p339_p3 }
   0xf   :  { %349 = shalt.err (!%p346_p7)
}
  0x10   :  { %s377_s22 = smov 128   ;;  %s378_s23 = smov 8  }
  0x11   :  { %24 = dma.hbm_to_vmem [thread:$0]  %s483_s2, 256, %s19_s13, [#allocation5], %s377_s22, %s377_s22, %s378_s23  }
  0x12   :  { %372 = dma.done.wait [#allocation5], 256  }
  0x13   :  { %373 = vsyncadd [#allocation5], 4294967040  ;;  %v28_v0 = vlaneseq  ;;  %v33_v1 = vstv %s481_s0  ;;  %v427_v5 = vld [vmem:[#allocation4] sm:$0xff]  ;;  %s379_s30 = smov 127   ;;  %s380_s2 = smov 1   ;;  %v436_v8 = vld [vmem:[#allocation4 + $0x8] sm:$0xff] }
  0x14   :  { %v299_v6 = vld [vmem:[%s482_s1] ss:$0 sm:$0xff]  ;;  %259 = vrot.lane.b32.xlu0 %v427_v5, %s379_s30  ;;  %261 = vrot.lane.b32.xlu1 %v427_v5, %s380_s2  ;;  %v381_v20 = vmov 683565275   ;;  %v382_v22 = vmov 2475754826  }
  0x15   :  { %v29_v2 = vshrl.u32 %v28_v0, 7  ;;  %v383_v24 = vmov 2131351028   ;;  %v384_v26 = vmov 2102212464   ;;  %s387_s0 = smov [#allocation7]  }
  0x16   :  { %v385_v28 = vmov 920167782   ;;  %v386_v35 = vmov 1326507024   ;;  %s287_s1 = sshll.u32 %s387_s0, 4  ;;  %s288_s1 = int_to_ptr.vmem [resolvable:$true] %s287_s1 }
  0x17   :  { %v34_v3 = vadd.s32 %v33_v1, %v29_v2  ;;  %s350_s4 = scalar_lea.vmem %s288_s1, 256  ;;  %p355_p9 = scmp.lt.s32.totalorder %s288_s1, %s288_s1 }
  0x18   :  { %271 = vrot.lane.b32.xlu0 %v436_v8, %s379_s30  ;;  %273 = vrot.lane.b32.xlu1 %v436_v8, %s380_s2  ;;  %p351_p8 = scmp.ne.s32.totalorder %s288_s1, %s350_s4  ;;  %p356_p10 = scmp.lt.s32.totalorder %s350_s4, %s350_s4 }
  0x19   :  { %v35_v4 = vcvt.s32.f32 %v34_v3 }
  0x1a   :  { %p357_p11 = por %p356_p10, %p355_p9 }
  0x1b   :  { %v434_v7 = vmul.f32 %v299_v6, %v35_v4 }
  0x1c   :  { %p358_p12 = pnand %p357_p11, %p351_p8 }
  0x1d   :  { %v47_v9 = vand.u32 2139095040, %v434_v7  ;;  %v44_v11 = vand.u32 2147483647, %v434_v7  ;;  %vm46_vm7 = vcmp.lt.s32.totalorder %v434_v7, 0  ;;  %vm136_vm12 = vweird.f32 %v434_v7 }
  0x1f   :  { %v48_v10 = vshrl.u32 %v47_v9, 23  ;;  %v51_v14 = vand.u32 8388607, %v44_v11  ;;  %vm45_vm8 = vcmp.le.f32.partialorder %v44_v11, 0.7853982 }
  0x21   :  { %v300_v12 = vadd.s32 4294967169, %v48_v10  ;;  %v52_v17 = vor.u32 8388608, %v51_v14 }
  0x23   :  { %v54_v13 = vadd.s32 1, %v300_v12  ;;  %v92_v37 = vshll.u32 %v52_v17, 8 }
  0x25   :  { %vm55_vm0 = vcmp.gt.s32.totalorder %v54_v13, 0 }
  0x26   :  { %v56_v15 = vsel %vm55_vm0, %v54_v13, 0 }
  0x27   :  { %v58_v16 = vand.u32 31, %v56_v15  ;;  %v57_v18 = vshrl.u32 %v56_v15, 5 }
  0x29   :  { %v59_v19 = vsub.s32 32, %v58_v16  ;;  %v61_v21 = vshll.u32 %v381_v20, %v58_v16  ;;  %v64_v23 = vshll.u32 %v382_v22, %v58_v16  ;;  %v67_v25 = vshll.u32 %v383_v24, %v58_v16 }
  0x2a   :  { %v70_v27 = vshll.u32 %v384_v26, %v58_v16  ;;  %v73_v29 = vshll.u32 %v385_v28, %v58_v16  ;;  %vm76_vm1 = vcmp.lt.s32.totalorder %v57_v18, 1  ;;  %vm79_vm2 = vcmp.lt.s32.totalorder %v57_v18, 4 }
  0x2b   :  { %v60_v30 = vshrl.u32 %v381_v20, %v59_v19  ;;  %v62_v31 = vshrl.u32 %v382_v22, %v59_v19  ;;  %v65_v32 = vshrl.u32 %v383_v24, %v59_v19  ;;  %v68_v33 = vshrl.u32 %v384_v26, %v59_v19 }
  0x2c   :  { %v71_v34 = vshrl.u32 %v385_v28, %v59_v19  ;;  %v74_v36 = vshrl.u32 %v386_v35, %v59_v19  ;;  %vm77_vm3 = vcmp.lt.s32.totalorder %v57_v18, 2  ;;  %vm78_vm4 = vcmp.lt.s32.totalorder %v57_v18, 3 }
  0x2d   :  { %v63_v38 = vor.u32 %v62_v31, %v61_v21  ;;  %v66_v39 = vor.u32 %v65_v32, %v64_v23  ;;  %v69_v40 = vor.u32 %v68_v33, %v67_v25  ;;  %v252_v33 = vand.u32 127, %v28_v0 }
  0x2e   :  { %v72_v41 = vor.u32 %v71_v34, %v70_v27  ;;  %v75_v42 = vor.u32 %v74_v36, %v73_v29 }
  0x2f   :  { %v80_v43 = vsel %vm76_vm1, %v60_v30, %v63_v38  ;;  %v81_v44 = vsel %vm79_vm2, %v69_v40, 2102212464  ;;  %v84_v45 = vsel %vm76_vm1, %v63_v38, %v66_v39  ;;  %v88_v46 = vsel %vm76_vm1, %v66_v39, %v69_v40 }
  0x30   :  { %v82_v47 = vsel %vm78_vm4, %v66_v39, %v81_v44  ;;  %v85_v48 = vsel %vm79_vm2, %v72_v41, 920167782  ;;  %v89_v49 = vsel %vm79_vm2, %v75_v42, 1326507024 }
  0x31   :  { %v86_v50 = vsel %vm78_vm4, %v69_v40, %v85_v48  ;;  %v90_v51 = vsel %vm78_vm4, %v72_v41, %v89_v49  ;;  %v83_v52 = vsel %vm77_vm3, %v80_v43, %v82_v47 }
  0x32   :  { %v87_v53 = vsel %vm77_vm3, %v84_v45, %v86_v50  ;;  %v91_v54 = vsel %vm77_vm3, %v88_v46, %v90_v51  ;;  %v99_v59 = vmul.u32 %v92_v37, %v83_v52 }
  0x33   :  { %v444_v55 = vmul.u32.u64.low %v92_v37, %v91_v54  ;;  %v445_v56 = vmul.u32.u64.high %v92_v37, %v91_v54, %v444_v55  ;;  %v447_v57 = vmul.u32.u64.low %v92_v37, %v87_v53  ;;  %v448_v58 = vmul.u32.u64.high %v92_v37, %v87_v53, %v447_v57 }
  0x34   :  { %v253_v37 = vand.u32 1, %v252_v33 }
  0x35   :  { %vm101_vm5 = vc.u32 %v445_v56, %v447_v57  ;;  %v102_v60 = vadd.s32 1, %v448_v58  ;;  %v100_v12 = vadd.s32 %v447_v57, %v445_v56 }
  0x36   :  { %vm254_vm13 = vcmp.eq.s32.totalorder %v253_v37, 0 }
  0x37   :  { %v103_v61 = vsel %vm101_vm5, %v102_v60, %v448_v58 }
  0x38   :  { %v104_v62 = vadd.s32 %v103_v61, %v99_v59 }
  0x3a   :  { %v105_v63 = vadd.s32 536870912, %v104_v62 }
  0x3c   :  { %v106_v1 = vshrl.u32 %v105_v63, 30 }
  0x3e   :  { %v107_v2 = vshll.u32 %v106_v1, 30  ;;  %v130_v24 = vsub.s32 4, %v106_v1 }
  0x40   :  { %v108_v3 = vsub.s32 %v104_v62, %v107_v2  ;;  %v131_v27 = vsel %vm46_vm7, %v130_v24, %v106_v1 }
  0x41   :  { %v133_v30 = vsel %vm45_vm8, 0, %v131_v27 }
  0x42   :  { %v110_v4 = vsub.s32 0, %v108_v3  ;;  %v240_v31 = vadd.s32 3, %v133_v30  ;;  %v137_v44 = vand.u32 3, %v133_v30 }
  0x44   :  { %v301_v6 = vmin.u32 %v110_v4, %v108_v3  ;;  %v241_v32 = vand.u32 3, %v240_v31  ;;  %vm139_vm14 = vcmp.eq.s32.totalorder %v137_v44, 0  ;;  %vm142_vm15 = vcmp.eq.s32.totalorder %v137_v44, 2 }
  0x45   :  { %vm138_vm0 = vcmp.lt.s32.totalorder %v137_v44, 2 }
  0x46   :  { %v112_v9 = vclz %v301_v6  ;;  %vm246_vm9 = vcmp.eq.s32.totalorder %v241_v32, 2  ;;  %vm243_vm10 = vcmp.eq.s32.totalorder %v241_v32, 0  ;;  %vm242_vm11 = vcmp.lt.s32.totalorder %v241_v32, 2 }
  0x48   :  { %v302_v10 = vadd.s32 4294967294, %v112_v9 }
  0x4a   :  { %vm303_vm6 = vcmp.lt.s32.totalorder %v302_v10, 0 }
  0x4b   :  { %v115_v13 = vsel %vm303_vm6, 0, %v302_v10 }
  0x4c   :  { %v116_v14 = vsub.s32 32, %v115_v13  ;;  %v117_v15 = vshll.u32 %v108_v3, %v115_v13  ;;  %v120_v16 = vsub.s32 4294967266, %v115_v13 }
  0x4e   :  { %v118_v17 = vshrl.u32 %v100_v12, %v116_v14  ;;  %v121_v18 = vadd.s32 127, %v120_v16 }
  0x50   :  { %v119_v19 = vor.u32 %v118_v17, %v117_v15  ;;  %v122_v20 = vshll.u32 %v121_v18, 23 }
  0x52   :  { %v123_v21 = vor.u32 4788187, %v122_v20  ;;  %v126_v22 = vcvt.s32.f32 %v119_v19 }
  0x54   :  { %v124_v23 = vand.u32 2147483647, %v123_v21 }
  0x56   :  { %v127_v25 = vmul.f32 %v126_v22, %v124_v23 }
  0x58   :  { %v128_v26 = vxor.u32 2147483648, %v127_v25 }
  0x5a   :  { %v129_v28 = vsel %vm46_vm7, %v128_v26, %v127_v25 }
  0x5b   :  { %v132_v29 = vsel %vm45_vm8, %v434_v7, %v129_v28 }
  0x5c   :  { %324 = vcosq.f32 %v132_v29 }
  0x5d   :  { %326 = vsinq.f32 %v132_v29 }
  0x66   :  { %v325_v34 = vpop.eup %324 }
  0x67   :  { %v327_v35 = vpop.eup %326  ;;  %v143_v36 = vxor.u32 2147483648, %v325_v34 }
  0x68   :  { %v140_v38 = vxor.u32 2147483648, %v327_v35 }
  0x69   :  { %v248_v11 = vsel %vm246_vm9, %v143_v36, %v327_v35  ;;  %v144_v46 = vsel %vm142_vm15, %v143_v36, %v327_v35 }
  0x6a   :  { %v245_v39 = vsel %vm243_vm10, %v325_v34, %v140_v38  ;;  %v141_v45 = vsel %vm139_vm14, %v325_v34, %v140_v38 }
  0x6b   :  { %v249_v40 = vsel %vm242_vm11, %v245_v39, %v248_v11  ;;  %v145_v47 = vsel %vm138_vm0, %v141_v45, %v144_v46 }
  0x6c   :  { %v250_v41 = vsel %vm136_vm12, nan, %v249_v40  ;;  %v146_v48 = vsel %vm136_vm12, nan, %v145_v47 }
  0x6d   :  { %v255_v42 = vsub.f32 0.0, %v250_v41  ;;  %v257_v43 = vsel %vm254_vm13, 0.0, %v250_v41  ;;  %v263_v49 = vmul.f32 %v427_v5, %v146_v48  ;;  %v275_v55 = vmul.f32 %v436_v8, %v146_v48 }
  0x6f   :  { %v256_v0 = vsel %vm254_vm13, %v255_v42, 0.0 }
  0x86   :  { %v260_v50 = vpop.permute.xlu0 %259  ;;  %v262_v51 = vpop.permute.xlu1 %261 }
  0x87   :  { %v264_v52 = vmul.f32 %v260_v50, %v256_v0  ;;  %v266_v53 = vmul.f32 %v262_v51, %v257_v43 }
  0x89   :  { %v265_v54 = vadd.f32 %v264_v52, %v263_v49 }
  0x8a   :  { %v272_v56 = vpop.permute.xlu0 %271  ;;  %v274_v57 = vpop.permute.xlu1 %273 }
  0x8b   :  { %v267_v58 = vadd.f32 %v266_v53, %v265_v54  ;;  %v276_v59 = vmul.f32 %v272_v56, %v256_v0  ;;  %v278_v60 = vmul.f32 %v274_v57, %v257_v43 }
  0x8d   :  { %268 = vst [vmem:[#allocation7] sm:$0xff] %v267_v58  ;;  %v277_v61 = vadd.f32 %v276_v59, %v275_v55 }
  0x8f   :  { %v279_v7 = vadd.f32 %v278_v60, %v277_v61 }
  0x91   :  { %281 = vst [vmem:[#allocation7 + $0x8] sm:$0xff] %v279_v7 }
  0x92   :  { %361 = shalt.err (!%p358_p12)
}
  0x93   :  { %s362_s7 = scalar_lea.hbm %s484_s3, 256 }
  0x94   :  { %p363_p13 = scmp.ne.s32.totalorder %s484_s3, %s362_s7  ;;  %p366_p0 = scmp.lt.u32.totalorder %s362_s7, %s484_s3 }
  0x96   :  { %p368_p1 = pnand %p366_p0, %p363_p13 }
  0x98   :  { %371 = shalt.err (!%p368_p1)
}
  0x99   :  { %293 = dma.vmem_to_hbm [thread:$0]  %s288_s1, 256, %s484_s3, [#allocation6], %s377_s22, %s377_s22, %s378_s23  }
  0x9a   :  { %374 = dma.done.wait [#allocation6], 256  }
  0x9b   :  { %375 = vsyncadd [#allocation6], 4294967040 }
  0x9c   :  { %297 = vsyncpa [#allocation5], 1 }
  0x9d   :  { %298 = vsyncpa [#allocation6], 1 }

</bundles_post_ra>
